<compile_context>
chip_gen: v7x
topology: tpu7x:2x2x1
jax: 0.10.0
libtpu: 0.0.40
codegen_flags: <defaults>
</compile_context>

<pallas_src>
import jax
import jax.numpy as jnp
from jax.experimental import pallas as pl
from jax.experimental.pallas import tpu as pltpu


def _renderer_kernel(x_ref, w_ref, b_ref, img_ref):
    # x_ref  : (1, C, D, T)   voxel block, lane-dense over the spatial plane
    # w_ref  : (C, 4) SMEM    packed mapping weights (cols 0..2 = RGB, col 3 = alpha)
    # b_ref  : (4,)   SMEM    packed mapping biases
    # img_ref: (1, 3, T)      lane-dense RGB output block
    C = x_ref.shape[1]

    # --- mapping: fused RGB + alpha heads via channel-outer scalar*vector FMAs (VPU).
    # Channel-outer accumulation keeps only ~6 live [D, T] f32 planes
    # (4 heads + current channel plane + exp plane); no xs / rgb lists materialized.
    x0 = x_ref[0, 0].astype(jnp.float32)                     # the module's .float()
    heads = [x0 * w_ref[0, k] + b_ref[k] for k in range(4)]  # each [D, T]
    for c in range(1, C):
        xc = x_ref[0, c].astype(jnp.float32)
        for k in range(4):
            heads[k] = heads[k] + xc * w_ref[c, k]

    # --- rendering: softmax over depth, composite of sigmoid(RGB heads) ---
    alpha = heads[3]                                         # [D, T]
    m = jnp.max(alpha, axis=0, keepdims=True)                # [1, T]
    e = jnp.exp(alpha - m)                                   # [D, T]
    # approx reciprocal (EUP vrcp) has ~1e-3 relative error on the softmax denom;
    # acceptable for the 2e-3 tolerance used here (switch approx=False if tighter
    # accuracy is ever required).
    inv_denom = pl.reciprocal(jnp.sum(e, axis=0, keepdims=True), approx=True)  # [1, T]

    # Sigmoid fused into the composite sum (no rgb planes materialized); the
    # transcendentals land on the EUP slot which has slack vs the VALU here.
    rows = [
        jnp.sum(e * jax.nn.sigmoid(heads[k]), axis=0, keepdims=True) * inv_denom
        for k in range(3)
    ]                                                        # 3 x [1, T]
    # Single store of the whole (3, T) output block.
    img_ref[0] = jnp.concatenate(rows, axis=0).astype(img_ref.dtype)


def _vmem_budget_bytes():
    """Generation-aware scoped-VMEM budget (bytes)."""
    try:
        cap = pltpu.get_tpu_info().vmem_capacity_bytes
    except Exception:
        cap = 64 << 20  # assume the smallest generation (v7x: 64 MiB per TensorCore)
    # Keep ~25% headroom for compiler-internal scratch; never request more than
    # 64 MiB even on 128 MiB parts (v5e/v6e) -> ~48 MiB effective cap on v7x.
    return int(min(64 << 20, (cap * 3) // 4))


def _choose_tile_hw(hw, c, d, in_itemsize, budget_bytes):
    """Largest lane-tile over the spatial plane whose working set fits the budget.

    Per output column the working set is:
      double-buffered input block      : 2 * C * D * itemsize
      live f32 [D, *] intermediates    : ~6 planes (counted as 8 for margin)
      double-buffered (3, *) f32 output: 2 * 3 * 4
    """
    per_col = 2 * c * d * in_itemsize + 8 * d * 4 + 2 * 3 * 4
    if per_col * hw <= budget_bytes:
        return hw  # whole plane in one block (full-extent last dim is always legal)
    t = (budget_bytes // per_col) // 128 * 128
    return max(int(t), 128)


def renderer_forward(voxels, w_rgb, b_rgb, w_a, b_a):
    """voxels: [B, C, D, H, W] (NCDHW) -> image [B, 3, H, W].

    voxels may (and should, for HBM bandwidth) be bfloat16: the kernel casts to f32
    before all math, matching the module's `.float()`.
    """
    B, C, D, H, W = voxels.shape
    HW = H * W

    # Free reshape (no transpose): channels-first kept, spatial plane on the lane axis.
    x = voxels.reshape(B, C, D, HW)

    # Pack the two heads into one weight / bias (each voxel plane read once in-kernel).
    w_packed = jnp.concatenate([w_rgb, w_a], axis=1).astype(jnp.float32)        # (C, 4)
    b_packed = jnp.concatenate([b_rgb[0], b_a[0]], axis=0).astype(jnp.float32)  # (4,)

    vmem_limit = _vmem_budget_bytes()
    T = _choose_tile_hw(HW, C, D, jnp.dtype(voxels.dtype).itemsize, vmem_limit)
    num_t = pl.cdiv(HW, T)  # T need not divide HW: last block is padded/masked

    img = pl.pallas_call(
        _renderer_kernel,
        out_shape=jax.ShapeDtypeStruct((B, 3, HW), jnp.float32),
        grid_spec=pltpu.PrefetchScalarGridSpec(
            num_scalar_prefetch=0,
            # HW-tile axis first (usually more steps than B) -> balanced megacore
            # sharding on v7x; both axes are independent.
            grid=(num_t, B),
            in_specs=[
                pl.BlockSpec((1, C, D, T), lambda t, b: (b, 0, 0, t)),
                pl.BlockSpec(memory_space=pltpu.MemorySpace.SMEM),  # packed weights
                pl.BlockSpec(memory_space=pltpu.MemorySpace.SMEM),  # packed biases
            ],
            out_specs=pl.BlockSpec((1, 3, T), lambda t, b: (b, 0, t)),
        ),
        compiler_params=pltpu.CompilerParams(
            dimension_semantics=("parallel", "parallel"),
            vmem_limit_bytes=vmem_limit,
        ),
    )(x, w_packed, b_packed)

    # Output is already NCHW-flattened; only a free reshape remains.
    return img.reshape(B, 3, H, W)


def renderer_reference(voxels, w_rgb, b_rgb, w_a, b_a):
    """Pure-JAX reference for correctness checking."""
    x = jnp.transpose(voxels, (0, 2, 3, 4, 1)).astype(jnp.float32)   # [B,D,H,W,C]
    rgb = jax.nn.sigmoid(jnp.einsum("bdhwc,ck->bdhwk", x, w_rgb) + b_rgb[0])
    alpha = jnp.einsum("bdhwc,ck->bdhwk", x, w_a) + b_a[0]
    wgt = jax.nn.softmax(alpha, axis=1)
    img = jnp.sum(wgt * rgb, axis=1)                                 # [B,H,W,3]
    return jnp.transpose(img, (0, 3, 1, 2))


if __name__ == "__main__":
    key = jax.random.PRNGKey(0)
    k_vox, k_wr, k_br, k_wa, k_ba = jax.random.split(key, 5)

    # small shapes: batch=2, channels=4, depth=8, spatial=16
    B, C, D, H, W = 2, 4, 8, 16, 16
    # bf16 voxels halve HBM read traffic; both kernel and reference cast to f32
    # before the math (matching the module's `.float()`), so they see identical data.
    voxels = jax.random.normal(k_vox, (B, C, D, H, W), dtype=jnp.float32).astype(
        jnp.bfloat16
    )

    # deterministic synthetic parameters (mapping head)
    w_rgb = jax.random.normal(k_wr, (C, 3), dtype=jnp.float32) * 0.5
    b_rgb = jax.random.normal(k_br, (1, 3), dtype=jnp.float32) * 0.1
    w_a = jax.random.normal(k_wa, (C, 1), dtype=jnp.float32) * 0.5
    b_a = jax.random.normal(k_ba, (1, 1), dtype=jnp.float32) * 0.1

    # TODO(synk): the `default=False` branch (mapping also returning color_index)
    # has no defined mapping semantics here; only the default=True path is implemented.

    image = renderer_forward(voxels, w_rgb, b_rgb, w_a, b_a)
    jax.block_until_ready(image)

    ref = renderer_reference(voxels, w_rgb, b_rgb, w_a, b_a)
    assert image.shape == (B, 3, H, W), image.shape
    assert jnp.allclose(image, ref, rtol=2e-3, atol=2e-3), "mismatch vs reference"

    print("KERNEL_OK")
</pallas_src>

<mosaic_0001>
module attributes {stable_mosaic.version = 11 : i64} {
  func.func @_renderer_kernel(%arg0: i32, %arg1: i32, %arg2: memref<1x4x8x256xbf16, #tpu.memory_space<vmem>>, %arg3: memref<4x4xf32, #tpu.memory_space<smem>>, %arg4: memref<4xf32, #tpu.memory_space<smem>>, %arg5: memref<1x3x256xf32, #tpu.memory_space<vmem>>) attributes {dimension_semantics = [#tpu.dimension_semantics<parallel>, #tpu.dimension_semantics<parallel>], iteration_bounds = array<i64: 1, 2>, scalar_prefetch = 0 : i64, scratch_operands = 0 : i64, tpu.core_type = #tpu.core_type<tc>, window_params = [{transform_indices = @transform_0, window_bounds = array<i64: 1, 4, 8, 256>}, {transform_indices = @transform_1, window_bounds = array<i64: 4, 4>}, {transform_indices = @transform_2, window_bounds = array<i64: 4>}, {transform_indices = @transform_3, window_bounds = array<i64: 1, 3, 256>}]} {
    %c0 = arith.constant 0 : index
    %c0_0 = arith.constant 0 : index
    %c0_1 = arith.constant 0 : index
    %c0_2 = arith.constant 0 : index
    %0 = vector.load %arg2[%c0, %c0_0, %c0_1, %c0_2] : memref<1x4x8x256xbf16, #tpu.memory_space<vmem>>, vector<1x1x8x256xbf16>
    %1 = vector.shape_cast %0 : vector<1x1x8x256xbf16> to vector<8x256xbf16>
    %2 = arith.extf %1 : vector<8x256xbf16> to vector<8x256xf32>
    %c0_3 = arith.constant 0 : index
    %c0_4 = arith.constant 0 : index
    %3 = memref.load %arg3[%c0_3, %c0_4] : memref<4x4xf32, #tpu.memory_space<smem>>
    %4 = vector.broadcast %3 : f32 to vector<8x256xf32>
    %5 = arith.mulf %2, %4 : vector<8x256xf32>
    %c0_5 = arith.constant 0 : index
    %6 = memref.load %arg4[%c0_5] : memref<4xf32, #tpu.memory_space<smem>>
    %7 = vector.broadcast %6 : f32 to vector<8x256xf32>
    %8 = arith.addf %5, %7 : vector<8x256xf32>
    %c0_6 = arith.constant 0 : index
    %c1 = arith.constant 1 : index
    %9 = memref.load %arg3[%c0_6, %c1] : memref<4x4xf32, #tpu.memory_space<smem>>
    %10 = vector.broadcast %9 : f32 to vector<8x256xf32>
    %11 = arith.mulf %2, %10 : vector<8x256xf32>
    %c1_7 = arith.constant 1 : index
    %12 = memref.load %arg4[%c1_7] : memref<4xf32, #tpu.memory_space<smem>>
    %13 = vector.broadcast %12 : f32 to vector<8x256xf32>
    %14 = arith.addf %11, %13 : vector<8x256xf32>
    %c0_8 = arith.constant 0 : index
    %c2 = arith.constant 2 : index
    %15 = memref.load %arg3[%c0_8, %c2] : memref<4x4xf32, #tpu.memory_space<smem>>
    %16 = vector.broadcast %15 : f32 to vector<8x256xf32>
    %17 = arith.mulf %2, %16 : vector<8x256xf32>
    %c2_9 = arith.constant 2 : index
    %18 = memref.load %arg4[%c2_9] : memref<4xf32, #tpu.memory_space<smem>>
    %19 = vector.broadcast %18 : f32 to vector<8x256xf32>
    %20 = arith.addf %17, %19 : vector<8x256xf32>
    %c0_10 = arith.constant 0 : index
    %c3 = arith.constant 3 : index
    %21 = memref.load %arg3[%c0_10, %c3] : memref<4x4xf32, #tpu.memory_space<smem>>
    %22 = vector.broadcast %21 : f32 to vector<8x256xf32>
    %23 = arith.mulf %2, %22 : vector<8x256xf32>
    %c3_11 = arith.constant 3 : index
    %24 = memref.load %arg4[%c3_11] : memref<4xf32, #tpu.memory_space<smem>>
    %25 = vector.broadcast %24 : f32 to vector<8x256xf32>
    %26 = arith.addf %23, %25 : vector<8x256xf32>
    %c0_12 = arith.constant 0 : index
    %c1_13 = arith.constant 1 : index
    %c0_14 = arith.constant 0 : index
    %c0_15 = arith.constant 0 : index
    %27 = vector.load %arg2[%c0_12, %c1_13, %c0_14, %c0_15] : memref<1x4x8x256xbf16, #tpu.memory_space<vmem>>, vector<1x1x8x256xbf16>
    %28 = vector.shape_cast %27 : vector<1x1x8x256xbf16> to vector<8x256xbf16>
    %29 = arith.extf %28 : vector<8x256xbf16> to vector<8x256xf32>
    %c1_16 = arith.constant 1 : index
    %c0_17 = arith.constant 0 : index
    %30 = memref.load %arg3[%c1_16, %c0_17] : memref<4x4xf32, #tpu.memory_space<smem>>
    %31 = vector.broadcast %30 : f32 to vector<8x256xf32>
    %32 = arith.mulf %29, %31 : vector<8x256xf32>
    %33 = arith.addf %8, %32 : vector<8x256xf32>
    %c1_18 = arith.constant 1 : index
    %c1_19 = arith.constant 1 : index
    %34 = memref.load %arg3[%c1_18, %c1_19] : memref<4x4xf32, #tpu.memory_space<smem>>
    %35 = vector.broadcast %34 : f32 to vector<8x256xf32>
    %36 = arith.mulf %29, %35 : vector<8x256xf32>
    %37 = arith.addf %14, %36 : vector<8x256xf32>
    %c1_20 = arith.constant 1 : index
    %c2_21 = arith.constant 2 : index
    %38 = memref.load %arg3[%c1_20, %c2_21] : memref<4x4xf32, #tpu.memory_space<smem>>
    %39 = vector.broadcast %38 : f32 to vector<8x256xf32>
    %40 = arith.mulf %29, %39 : vector<8x256xf32>
    %41 = arith.addf %20, %40 : vector<8x256xf32>
    %c1_22 = arith.constant 1 : index
    %c3_23 = arith.constant 3 : index
    %42 = memref.load %arg3[%c1_22, %c3_23] : memref<4x4xf32, #tpu.memory_space<smem>>
    %43 = vector.broadcast %42 : f32 to vector<8x256xf32>
    %44 = arith.mulf %29, %43 : vector<8x256xf32>
    %45 = arith.addf %26, %44 : vector<8x256xf32>
    %c0_24 = arith.constant 0 : index
    %c2_25 = arith.constant 2 : index
    %c0_26 = arith.constant 0 : index
    %c0_27 = arith.constant 0 : index
    %46 = vector.load %arg2[%c0_24, %c2_25, %c0_26, %c0_27] : memref<1x4x8x256xbf16, #tpu.memory_space<vmem>>, vector<1x1x8x256xbf16>
    %47 = vector.shape_cast %46 : vector<1x1x8x256xbf16> to vector<8x256xbf16>
    %48 = arith.extf %47 : vector<8x256xbf16> to vector<8x256xf32>
    %c2_28 = arith.constant 2 : index
    %c0_29 = arith.constant 0 : index
    %49 = memref.load %arg3[%c2_28, %c0_29] : memref<4x4xf32, #tpu.memory_space<smem>>
    %50 = vector.broadcast %49 : f32 to vector<8x256xf32>
    %51 = arith.mulf %48, %50 : vector<8x256xf32>
    %52 = arith.addf %33, %51 : vector<8x256xf32>
    %c2_30 = arith.constant 2 : index
    %c1_31 = arith.constant 1 : index
    %53 = memref.load %arg3[%c2_30, %c1_31] : memref<4x4xf32, #tpu.memory_space<smem>>
    %54 = vector.broadcast %53 : f32 to vector<8x256xf32>
    %55 = arith.mulf %48, %54 : vector<8x256xf32>
    %56 = arith.addf %37, %55 : vector<8x256xf32>
    %c2_32 = arith.constant 2 : index
    %c2_33 = arith.constant 2 : index
    %57 = memref.load %arg3[%c2_32, %c2_33] : memref<4x4xf32, #tpu.memory_space<smem>>
    %58 = vector.broadcast %57 : f32 to vector<8x256xf32>
    %59 = arith.mulf %48, %58 : vector<8x256xf32>
    %60 = arith.addf %41, %59 : vector<8x256xf32>
    %c2_34 = arith.constant 2 : index
    %c3_35 = arith.constant 3 : index
    %61 = memref.load %arg3[%c2_34, %c3_35] : memref<4x4xf32, #tpu.memory_space<smem>>
    %62 = vector.broadcast %61 : f32 to vector<8x256xf32>
    %63 = arith.mulf %48, %62 : vector<8x256xf32>
    %64 = arith.addf %45, %63 : vector<8x256xf32>
    %c0_36 = arith.constant 0 : index
    %c3_37 = arith.constant 3 : index
    %c0_38 = arith.constant 0 : index
    %c0_39 = arith.constant 0 : index
    %65 = vector.load %arg2[%c0_36, %c3_37, %c0_38, %c0_39] : memref<1x4x8x256xbf16, #tpu.memory_space<vmem>>, vector<1x1x8x256xbf16>
    %66 = vector.shape_cast %65 : vector<1x1x8x256xbf16> to vector<8x256xbf16>
    %67 = arith.extf %66 : vector<8x256xbf16> to vector<8x256xf32>
    %c3_40 = arith.constant 3 : index
    %c0_41 = arith.constant 0 : index
    %68 = memref.load %arg3[%c3_40, %c0_41] : memref<4x4xf32, #tpu.memory_space<smem>>
    %69 = vector.broadcast %68 : f32 to vector<8x256xf32>
    %70 = arith.mulf %67, %69 : vector<8x256xf32>
    %71 = arith.addf %52, %70 : vector<8x256xf32>
    %c3_42 = arith.constant 3 : index
    %c1_43 = arith.constant 1 : index
    %72 = memref.load %arg3[%c3_42, %c1_43] : memref<4x4xf32, #tpu.memory_space<smem>>
    %73 = vector.broadcast %72 : f32 to vector<8x256xf32>
    %74 = arith.mulf %67, %73 : vector<8x256xf32>
    %75 = arith.addf %56, %74 : vector<8x256xf32>
    %c3_44 = arith.constant 3 : index
    %c2_45 = arith.constant 2 : index
    %76 = memref.load %arg3[%c3_44, %c2_45] : memref<4x4xf32, #tpu.memory_space<smem>>
    %77 = vector.broadcast %76 : f32 to vector<8x256xf32>
    %78 = arith.mulf %67, %77 : vector<8x256xf32>
    %79 = arith.addf %60, %78 : vector<8x256xf32>
    %c3_46 = arith.constant 3 : index
    %c3_47 = arith.constant 3 : index
    %80 = memref.load %arg3[%c3_46, %c3_47] : memref<4x4xf32, #tpu.memory_space<smem>>
    %81 = vector.broadcast %80 : f32 to vector<8x256xf32>
    %82 = arith.mulf %67, %81 : vector<8x256xf32>
    %83 = arith.addf %64, %82 : vector<8x256xf32>
    %cst = arith.constant dense<0xFF800000> : vector<256xf32>
    %84 = vector.multi_reduction <maximumf>, %83, %cst [0] : vector<8x256xf32> to vector<256xf32>
    %85 = vector.shape_cast %84 : vector<256xf32> to vector<1x256xf32>
    %86 = vector.broadcast %85 : vector<1x256xf32> to vector<8x256xf32>
    %87 = arith.subf %83, %86 : vector<8x256xf32>
    %88 = math.exp %87 : vector<8x256xf32>
    %cst_48 = arith.constant dense<0.000000e+00> : vector<256xf32>
    %89 = vector.multi_reduction <add>, %88, %cst_48 [0] : vector<8x256xf32> to vector<256xf32>
    %90 = vector.shape_cast %89 : vector<256xf32> to vector<1x256xf32>
    %91 = tpu.reciprocal %90 {approx = true} : vector<1x256xf32> -> vector<1x256xf32>
    %92 = arith.negf %71 : vector<8x256xf32>
    %93 = math.exp %92 : vector<8x256xf32>
    %cst_49 = arith.constant 1.000000e+00 : f32
    %94 = vector.broadcast %cst_49 : f32 to vector<8x256xf32>
    %95 = arith.addf %94, %93 : vector<8x256xf32>
    %96 = arith.divf %94, %95 : vector<8x256xf32>
    %97 = arith.mulf %88, %96 : vector<8x256xf32>
    %cst_50 = arith.constant dense<0.000000e+00> : vector<256xf32>
    %98 = vector.multi_reduction <add>, %97, %cst_50 [0] : vector<8x256xf32> to vector<256xf32>
    %99 = vector.shape_cast %98 : vector<256xf32> to vector<1x256xf32>
    %100 = arith.mulf %99, %91 : vector<1x256xf32>
    %101 = arith.negf %75 : vector<8x256xf32>
    %102 = math.exp %101 : vector<8x256xf32>
    %cst_51 = arith.constant 1.000000e+00 : f32
    %103 = vector.broadcast %cst_51 : f32 to vector<8x256xf32>
    %104 = arith.addf %103, %102 : vector<8x256xf32>
    %105 = arith.divf %103, %104 : vector<8x256xf32>
    %106 = arith.mulf %88, %105 : vector<8x256xf32>
    %cst_52 = arith.constant dense<0.000000e+00> : vector<256xf32>
    %107 = vector.multi_reduction <add>, %106, %cst_52 [0] : vector<8x256xf32> to vector<256xf32>
    %108 = vector.shape_cast %107 : vector<256xf32> to vector<1x256xf32>
    %109 = arith.mulf %108, %91 : vector<1x256xf32>
    %110 = arith.negf %79 : vector<8x256xf32>
    %111 = math.exp %110 : vector<8x256xf32>
    %cst_53 = arith.constant 1.000000e+00 : f32
    %112 = vector.broadcast %cst_53 : f32 to vector<8x256xf32>
    %113 = arith.addf %112, %111 : vector<8x256xf32>
    %114 = arith.divf %112, %113 : vector<8x256xf32>
    %115 = arith.mulf %88, %114 : vector<8x256xf32>
    %cst_54 = arith.constant dense<0.000000e+00> : vector<256xf32>
    %116 = vector.multi_reduction <add>, %115, %cst_54 [0] : vector<8x256xf32> to vector<256xf32>
    %117 = vector.shape_cast %116 : vector<256xf32> to vector<1x256xf32>
    %118 = arith.mulf %117, %91 : vector<1x256xf32>
    %119 = tpu.concatenate %100, %109, %118 in 0 : vector<1x256xf32>, vector<1x256xf32>, vector<1x256xf32> -> vector<3x256xf32>
    %c0_55 = arith.constant 0 : index
    %c0_56 = arith.constant 0 : index
    %c0_57 = arith.constant 0 : index
    %120 = vector.load %arg5[%c0_55, %c0_56, %c0_57] : memref<1x3x256xf32, #tpu.memory_space<vmem>>, vector<1x3x256xf32>
    %121 = vector.shape_cast %120 : vector<1x3x256xf32> to vector<3x256xf32>
    %122 = vector.shape_cast %119 : vector<3x256xf32> to vector<1x3x256xf32>
    tpu.vector_store %arg5[%c0_55, %c0_56, %c0_57], %122 {strides = array<i32>} : memref<1x3x256xf32, #tpu.memory_space<vmem>>, vector<1x3x256xf32>,
    return
  }
  func.func @transform_0(%arg0: i32, %arg1: i32) -> (i32, i32, i32, i32) {
    %c0_i32 = arith.constant 0 : i32
    %c0_i32_0 = arith.constant 0 : i32
    %c0_i32_1 = arith.constant 0 : i32
    return %arg1, %c0_i32, %c0_i32_0, %arg0 : i32, i32, i32, i32
  }
  func.func @transform_1(%arg0: i32, %arg1: i32) -> (i32, i32) {
    %c0_i32 = arith.constant 0 : i32
    %c0_i32_0 = arith.constant 0 : i32
    %c0_i32_1 = arith.constant 0 : i32
    return %c0_i32, %c0_i32_0 : i32, i32
  }
  func.func @transform_2(%arg0: i32, %arg1: i32) -> i32 {
    %c0_i32 = arith.constant 0 : i32
    %c0_i32_0 = arith.constant 0 : i32
    return %c0_i32 : i32
  }
  func.func @transform_3(%arg0: i32, %arg1: i32) -> (i32, i32, i32) {
    %c0_i32 = arith.constant 0 : i32
    %c0_i32_0 = arith.constant 0 : i32
    return %arg1, %c0_i32, %arg0 : i32, i32, i32
  }
}

</mosaic_0001>

<bundles_post_ra>
// kernel: tpu_custom_call.1
= control target key start
LH: loop header
LB: loop body
LE: loop exit
PB: predicated region body
PF: predicated region fallthrough
CT: control target
= control target key end

     0   :  { %8 = vsyncpa [#allocation3], 0  ;;  %s1143_s0 = inlined_call_operand.hbm [shape: bf16[2,4,8,256], index: 0, kind: input, shape index: {}]   ;;  %s1144_s1 = inlined_call_operand.hbm [shape: f32[4,4], index: 1, kind: input, shape index: {}]   ;;  %s1145_s2 = inlined_call_operand.vmem [shape: f32[4], index: 2, kind: input, shape index: {}]   ;;  %s1146_s3 = inlined_call_operand.vmem [shape: f32[2,3,256], index: 3, kind: output, shape index: {}]  }
   0x1   :  { %10 = vsyncpa [#allocation3 + $0x1], 0 }
   0x2   :  { %11 = vsyncpa [#allocation4], 0 }
   0x3   :  { %12 = vsyncpa [#allocation5], 0  ;;  %s908_s12 = smov 0   ;;  %s910_s13 = smov 0  }
   0x4   :  { %s912_s14 = smov 0   ;;  %s914_s15 = smov 0  }
   0x5   :  { %s916_s16 = smov 0   ;;  %s918_s17 = smov 0  }
   0x6 LB: > { %s609_s18 = sadd.s32 4294967295, %s881_s17   ;;  %s39_s19 = sadd.s32 1, %s869_s14  ;;  %s881_s17 = sphi %s918_s17, %s18_s17   ;;  %s877_s16 = sphi %s916_s16, %s1161_s16   ;;  %s873_s15 = sphi %s914_s15, %s1160_s15   ;;  %s869_s14 = sphi %s912_s14, %s1159_s14   ;;  %s865_s13 = sphi %s910_s13, %s1158_s13   ;;  %s861_s12 = sphi %s908_s12, %s1157_s12  }
   0x7   : > { %p46_p0 = scmp.ne.s32.totalorder %s869_s14, %s865_s13  ;;  %p47_p1 = scmp.eq.s32.totalorder %s881_s17, 0 }
   0x8   : > { %p52_p2 = scmp.ne.s32.totalorder %s865_s13, %s861_s12  ;;  %p942_p3 = scmp.eq.s32.totalorder %s609_s18, 0 }
   0x9   : > { %p48_p4 = por %p47_p1, %p46_p0  ;;  %p611_p5 = scmp.ge.s32.totalorder %s881_s17, 1 }
   0xa   : > { %s1150_s20 = scalar_select %p942_p3, 1, 0 }
   0xb   : > { %p949_p6 = por %p942_p3, %p52_p2  ;;  %p133_p7 = scmp.lt.s32.totalorder %s881_s17, 3 }
   0xc   : > { %p678_p9 = scmp.lt.s32.totalorder %s881_s17, 2  ;;  %s155_s25 = sshll.u32 %s1145_s2, 4  ;;  %s156_s25 = int_to_ptr.vmem [resolvable:$true] %s155_s25 }
   0xd   : > { %s1151_s21 = scalar_select %p949_p6, 1, 0 }
   0xe   : > { %p954_p8 = pnand %p611_p5, %p133_p7  ;;  %p964_p11 = pnand %p678_p9, %p48_p4 }
   0xf   : > { %s27_s28 = sadd.s32 1, %s877_s16  ;;  %s765_s4 = scalar_lea.hbm %s1144_s1, 64 }
  0x10   : > { %p665_p10 = pneg %p954_p8  ;;  %p766_p13 = scmp.ne.s32.totalorder %s1144_s1, %s765_s4 }
  0x11   : > { %p772_p4 = scmp.lt.u32.totalorder %s765_s4, %s1144_s1 }
  0x12   : > { %p970_p12 = pnand %p665_p10, %p942_p3 }
  0x14   : > { %p767_p0 = pneg %p970_p12 }
  0x16   : > { %p768_p1 = pnand %p767_p0, %p766_p13 }
  0x18   : > { %p769_p2 = pneg %p768_p1 }
  0x1a   : > { %p774_p5 = pnand %p772_p4, %p769_p2 }
  0x1c   : > { %777 = shalt.err (!%p774_p5)
}
  0x1d   : > { %s883_s9 = smov [#allocation6]   ;;  %s778_s12 = scalar_lea.vmem %s156_s25, 16 }
  0x1e   : > { %668 = dma.hbm_to_smem (!%p970_p12), %s1144_s1, 64, %s883_s9, [#allocation4]  }
  0x1f   : > { %p779_p7 = scmp.ne.s32.totalorder %s156_s25, %s778_s12  ;;  %p786_p3 = scmp.lt.s32.totalorder %s156_s25, %s156_s25 }
  0x20   : > { %p787_p13 = scmp.lt.s32.totalorder %s778_s12, %s778_s12 }
  0x21   : > { %p781_p9 = pnand %p779_p7, %p767_p0 }
  0x22   : > { %p788_p1 = por %p787_p13, %p786_p3 }
  0x23   : > { %p782_p10 = pneg %p781_p9 }
  0x25   : > { %p789_p6 = pnand %p788_p1, %p782_p10 }
  0x27   : > { %792 = shalt.err (!%p789_p6)
}
  0x28   : > { %s884_s18 = smov [#allocation7]   ;;  %p28_p2 = scmp.ge.s32.totalorder %s27_s28, 2 }
  0x29   : > { %671 = dma.vmem_to_smem (!%p970_p12), %s156_s25, 16, %s884_s18, [#allocation5]  }
  0x2a   : > { %s166_s23 = sand.u32 1, %s869_s14   ;;  %s1163_s28 = smov (%p28_p2, %s27_s28), 0 }
  0x2b   : > { %s615_s24 = sshll.u32 %s166_s23, 5  ;;  %s653_s29 = sshll.u32 %s877_s16, 9 }
  0x2c   : > { %s34_s30 = ssub.s32 %s877_s16, %s1163_s28  ;;  %s1002_s27 = scalar_lea.hbm %s1143_s0, %s653_s29 }
  0x2d   : > { %p37_p3 = scmp.eq.s32.totalorder %s34_s30, 0  ;;  %s170_s25 = scalar_lea.vmem [#allocation2], %s615_s24 }
  0x2e   : > { %s179_s6 = sshll.u32 %s170_s25, 4  ;;  %s1011_s8 = scalar_lea.sflag [#allocation3], %s166_s23  ;;  %s1004_s6 = int_to_ptr.vmem [resolvable:$true] %s179_s6 }
  0x2f   : > { %s1009_s7 = scalar_select %p37_p3, %s869_s14, %s39_s19  }
  0x30   : > { %s793_s9 = scalar_lea.hbm %s1002_s27, 512  ;;  %p795_p12 = pneg %p964_p11 }
  0x31   : > { %p794_p6 = scmp.ne.s32.totalorder %s1002_s27, %s793_s9  ;;  %s798_s12 = scalar_lea.hbm %s1143_s0, 1024 }
  0x32   : > { %p799_p5 = scmp.lt.u32.totalorder %s1002_s27, %s1143_s0  ;;  %p800_p7 = scmp.lt.u32.totalorder %s798_s12, %s793_s9 }
  0x33   : > { %p796_p0 = pnand %p795_p12, %p794_p6  ;;  %p802_p10 = scmp.lt.u32.totalorder %s793_s9, %s1002_s27 }
  0x34   : > { %p801_p9 = por %p800_p7, %p799_p5 }
  0x35   : > { %p797_p4 = pneg %p796_p0 }
  0x36   : > { %p803_p13 = por %p802_p10, %p801_p9 }
  0x38   : > { %p804_p1 = pnand %p803_p13, %p797_p4 }
  0x3a   : > { %807 = shalt.err (!%p804_p1)
}
  0x3b   : > { %s808_s19 = scalar_lea.vmem %s1004_s6, 512  ;;  %s885_s23 = smov [#allocation2]  }
  0x3c   : > { %p809_p2 = scmp.ne.s32.totalorder %s1004_s6, %s808_s19  ;;  %s813_s29 = sshll.u32 %s885_s23, 4  ;;  %s814_s29 = int_to_ptr.vmem [resolvable:$false] %s813_s29 }
  0x3d   : > { %s815_s30 = scalar_lea.vmem %s814_s29, 1024  ;;  %p816_p0 = scmp.lt.s32.totalorder %s1004_s6, %s814_s29 }
  0x3e   : > { %p811_p3 = pnand %p809_p2, %p795_p12  ;;  %p817_p5 = scmp.lt.s32.totalorder %s815_s30, %s808_s19 }
  0x40   : > { %p812_p6 = pneg %p811_p3  ;;  %p818_p7 = por %p817_p5, %p816_p0 }
  0x42   : > { %p819_p9 = pnand %p818_p7, %p812_p6 }
  0x44   : > { %822 = shalt.err (!%p819_p9)
}
  0x45   : > { %s886_s4 = smov 128   ;;  %s887_s5 = smov 8  }
  0x46   : > { %675 = dma.hbm_to_vmem [thread:$0]  (!%p964_p11), %s1002_s27, 512, %s1004_s6, %s1011_s8, %s886_s4, %s886_s4, %s887_s5  }
  0x47   : > { %191 = sbr.rel (%p954_p8) target bundleno = 173 (0xad), region = 32  ;;  %s193_s25 = sand.u32 (!%p954_p8), 1, %s865_s13  }
  0x48   : > { %s619_s9 = sshll.u32 (!%p954_p8), %s193_s25, 5  ;;  %s194_s10 = scalar_lea.sflag (!%p954_p8), [#allocation3], %s193_s25 }
  0x49   : > { %s197_s11 = scalar_lea.vmem (!%p954_p8), [#allocation2], %s619_s9  ;;  %p1155_p12 = scmp.ne.s32.totalorder (!%p954_p8), %s1151_s21, 0 }
  0x4e   : > { %848 = dma.done.wait (%p1155_p12), %s194_s10, 512  }
  0x4f   : > { %850 = vsyncadd (%p1155_p12), %s194_s10, 4294966784  ;;  %p1156_p4 = scmp.ne.s32.totalorder %s1150_s20, 0 }
  0x51   : > { %852 = dma.done.wait (%p1156_p4), [#allocation4], 64  }
  0x52   : > { %854 = vsyncadd (%p1156_p4), [#allocation4], 4294967232 }
  0x53   : > { %856 = dma.done.wait (%p1156_p4), [#allocation5], 16  }
  0x54   : > { %858 = vsyncadd (%p1156_p4), [#allocation5], 4294967280 }
  0x55   : > { %210 = sfence }
  0x56   : > { %s247_s22 = sld [smem:[#allocation6]]  ;;  %s624_s27 = sld [smem:[#allocation6 + $0x1]]  ;;  %v244_v0 = vld [vmem:[%s197_s11] sm:$0xff]  ;;  %v630_v1 = vld [vmem:[%s197_s11 + $0x8] sm:$0xff]  ;;  %v635_v4 = vld [vmem:[%s197_s11 + $0x10] sm:$0xff]  ;;  %vm479_vm0 = vcmask 1040384  }
  0x57   : > { %s1054_s26 = sld [smem:[#allocation7]]  ;;  %s1056_s21 = sld [smem:[#allocation7 + $0x1]]  ;;  %v245_v2 = vunpack.c.l.bf16 %v244_v0  ;;  %v246_v3 = vunpack.c.h.bf16 %v244_v0  ;;  %v281_v6 = vunpack.c.l.bf16 %v630_v1  ;;  %v282_v7 = vunpack.c.h.bf16 %v630_v1  ;;  %v640_v8 = vld [vmem:[%s197_s11 + $0x18] sm:$0xff] }
  0x58   : > { %s1058_s6 = sld [smem:[#allocation6 + $0x2]]  ;;  %s1062_s12 = sld [smem:[#allocation6 + $0x3]]  ;;  %v309_v15 = vunpack.c.l.bf16 %v635_v4  ;;  %v310_v16 = vunpack.c.h.bf16 %v635_v4  ;;  %v1079_v19 = vunpack.c.l.bf16 %v640_v8  ;;  %v1081_v20 = vunpack.c.h.bf16 %v640_v8 }
  0x59   : > { %s1060_s8 = sld [smem:[#allocation7 + $0x2]]  ;;  %s1064_s20 = sld [smem:[#allocation7 + $0x3]]  ;;  %vm482_vm1 = vcmask 1041408  }
  0x5a   : > { %s1066_s18 = sld [smem:[#allocation6 + $0x80]]  ;;  %s1069_s24 = sld [smem:[#allocation6 + $0x81]] }
  0x5b   : > { %s1071_s19 = sld [smem:[#allocation6 + $0x82]]  ;;  %s1073_s23 = sld [smem:[#allocation6 + $0x83]] }
  0x5c   : > { %v248_v5 = vstv %s247_s22  ;;  %v256_v12 = vstv %s624_s27  ;;  %s1075_s29 = sld [smem:[#allocation6 + $0x100]]  ;;  %s1083_s30 = sld [smem:[#allocation6 + $0x101]] }
  0x5d   : > { %v249_v9 = vmul.f32 %v248_v5, %v245_v2  ;;  %v250_v10 = vmul.f32 %v248_v5, %v246_v3  ;;  %v252_v11 = vstv %s1054_s26  ;;  %v257_v13 = vmul.f32 %v256_v12, %v245_v2  ;;  %s1085_s4 = sld [smem:[#allocation6 + $0x102]]  ;;  %s1089_s5 = sld [smem:[#allocation6 + $0x103]] }
  0x5e   : > { %v258_v14 = vmul.f32 %v256_v12, %v246_v3  ;;  %v260_v17 = vstv %s1056_s21  ;;  %v264_v18 = vstv %s1058_s6  ;;  %v272_v28 = vstv %s1062_s12  ;;  %s1091_s25 = sld [smem:[#allocation6 + $0x180]]  ;;  %s1099_s9 = sld [smem:[#allocation6 + $0x181]] }
  0x5f   : > { %v253_v21 = vadd.f32 %v252_v11, %v249_v9  ;;  %v254_v22 = vadd.f32 %v252_v11, %v250_v10  ;;  %v265_v23 = vmul.f32 %v264_v18, %v245_v2  ;;  %v266_v24 = vmul.f32 %v264_v18, %v246_v3  ;;  %s1101_s10 = sld [smem:[#allocation6 + $0x182]]  ;;  %s1103_s11 = sld [smem:[#allocation6 + $0x183]] }
  0x60   : > { %v261_v25 = vadd.f32 %v260_v17, %v257_v13  ;;  %v262_v26 = vadd.f32 %v260_v17, %v258_v14  ;;  %v268_v27 = vstv %s1060_s8  ;;  %v273_v31 = vmul.f32 %v272_v28, %v245_v2  ;;  %p235_p8 = scmp.lt.s32.totalorder %s873_s15, 1 }
  0x61   : > { %v269_v29 = vadd.f32 %v268_v27, %v265_v23  ;;  %v270_v30 = vadd.f32 %v268_v27, %v266_v24  ;;  %v274_v32 = vmul.f32 %v272_v28, %v246_v3  ;;  %v276_v33 = vstv %s1064_s20 }
  0x62   : > { %v284_v34 = vstv %s1066_s18  ;;  %v290_v35 = vstv %s1069_s24  ;;  %v296_v36 = vstv %s1071_s19  ;;  %v277_v37 = vadd.f32 %v276_v33, %v273_v31  ;;  %s1165_s15 = smov (!%p235_p8, %s873_s15), 1 }
  0x63   : > { %v278_v38 = vadd.f32 %v276_v33, %v274_v32  ;;  %v285_v39 = vmul.f32 %v284_v34, %v281_v6  ;;  %v286_v40 = vmul.f32 %v284_v34, %v282_v7  ;;  %v291_v41 = vmul.f32 %v290_v35, %v281_v6  ;;  %s654_s22 = sshll.u32 %s1165_s15, 3 }
  0x64   : > { %v292_v42 = vmul.f32 %v290_v35, %v282_v7  ;;  %v297_v43 = vmul.f32 %v296_v36, %v281_v6  ;;  %v298_v44 = vmul.f32 %v296_v36, %v282_v7  ;;  %v302_v47 = vstv %s1073_s23  ;;  %s242_s21 = scalar_lea.vmem %s1146_s3, %s654_s22 }
  0x65   : > { %v287_v45 = vadd.f32 %v285_v39, %v253_v21  ;;  %v288_v46 = vadd.f32 %v286_v40, %v254_v22  ;;  %v312_v48 = vstv %s1075_s29  ;;  %v293_v49 = vadd.f32 %v291_v41, %v261_v25 }
  0x66   : > { %v294_v50 = vadd.f32 %v292_v42, %v262_v26  ;;  %v299_v51 = vadd.f32 %v297_v43, %v269_v29  ;;  %v300_v52 = vadd.f32 %v298_v44, %v270_v30  ;;  %v303_v53 = vmul.f32 %v302_v47, %v281_v6 }
  0x67   : > { %v304_v54 = vmul.f32 %v302_v47, %v282_v7  ;;  %v313_v55 = vmul.f32 %v312_v48, %v309_v15  ;;  %v314_v56 = vmul.f32 %v312_v48, %v310_v16  ;;  %v318_v57 = vstv %s1083_s30 }
  0x68   : > { %v324_v58 = vstv %s1085_s4  ;;  %v330_v59 = vstv %s1089_s5  ;;  %v340_v60 = vstv %s1091_s25  ;;  %v305_v61 = vadd.f32 %v303_v53, %v277_v37 }
  0x69   : > { %v306_v62 = vadd.f32 %v304_v54, %v278_v38  ;;  %v315_v63 = vadd.f32 %v313_v55, %v287_v45  ;;  %v316_v0 = vadd.f32 %v314_v56, %v288_v46  ;;  %v319_v1 = vmul.f32 %v318_v57, %v309_v15 }
  0x6a   : > { %v320_v2 = vmul.f32 %v318_v57, %v310_v16  ;;  %v325_v3 = vmul.f32 %v324_v58, %v309_v15  ;;  %v326_v4 = vmul.f32 %v324_v58, %v310_v16  ;;  %v331_v5 = vmul.f32 %v330_v59, %v309_v15 }
  0x6b   : > { %v332_v6 = vmul.f32 %v330_v59, %v310_v16  ;;  %v341_v7 = vmul.f32 %v340_v60, %v1079_v19  ;;  %v342_v8 = vmul.f32 %v340_v60, %v1081_v20  ;;  %v321_v9 = vadd.f32 %v319_v1, %v293_v49 }
  0x6c   : > { %v322_v10 = vadd.f32 %v320_v2, %v294_v50  ;;  %v327_v11 = vadd.f32 %v325_v3, %v299_v51  ;;  %v328_v12 = vadd.f32 %v326_v4, %v300_v52  ;;  %v333_v13 = vadd.f32 %v331_v5, %v305_v61 }
  0x6d   : > { %v343_v14 = vadd.f32 %v341_v7, %v315_v63  ;;  %v344_v17 = vadd.f32 %v342_v8, %v316_v0  ;;  %v334_v18 = vadd.f32 %v332_v6, %v306_v62  ;;  %v346_v21 = vstv %s1099_s9 }
  0x6e   : > { %v352_v22 = vstv %s1101_s10  ;;  %v358_v23 = vstv %s1103_s11  ;;  %v347_v24 = vmul.f32 %v346_v21, %v1079_v19  ;;  %v348_v15 = vmul.f32 %v346_v21, %v1081_v20 }
  0x6f   : > { %v353_v16 = vmul.f32 %v352_v22, %v1079_v19  ;;  %v354_v25 = vmul.f32 %v352_v22, %v1081_v20  ;;  %v359_v26 = vmul.f32 %v358_v23, %v1079_v19  ;;  %v360_v27 = vmul.f32 %v358_v23, %v1081_v20 }
  0x70   : > { %v645_v28 = vmul.f32 -1.442695, %v343_v14  ;;  %v646_v29 = vmul.f32 -1.442695, %v344_v17  ;;  %v349_v30 = vadd.f32 %v347_v24, %v321_v9  ;;  %v350_v31 = vadd.f32 %v348_v15, %v322_v10 }
  0x71   : > { %v355_v32 = vadd.f32 %v353_v16, %v327_v11  ;;  %v356_v33 = vadd.f32 %v354_v25, %v328_v12  ;;  %v361_v34 = vadd.f32 %v359_v26, %v333_v13  ;;  %v362_v35 = vadd.f32 %v360_v27, %v334_v18 }
  0x72   : > { %733 = vpow2.f32 %v645_v28  ;;  %v647_v36 = vmul.f32 -1.442695, %v349_v30  ;;  %v648_v37 = vmul.f32 -1.442695, %v350_v31 }
  0x73   : > { %735 = vpow2.f32 %v646_v29  ;;  %v649_v38 = vmul.f32 -1.442695, %v355_v32  ;;  %v363_v39 = vrot.slane %v361_v34, 4  ;;  %v369_v40 = vrot.slane %v362_v35, 4 }
  0x74   : > { %v650_v41 = vmul.f32 -1.442695, %v356_v33  ;;  %737 = vpow2.f32 %v647_v36 }
  0x75   : > { %v364_v19 = vmax.f32 %v361_v34, %v363_v39  ;;  %v370_v42 = vmax.f32 %v362_v35, %v369_v40  ;;  %739 = vpow2.f32 %v648_v37 }
  0x76   : > { %741 = vpow2.f32 %v649_v38 }
  0x77   : > { %v365_v20 = vrot.slane %v364_v19, 2  ;;  %v371_v43 = vrot.slane %v370_v42, 2  ;;  %743 = vpow2.f32 %v650_v41 }
  0x79   : > { %v366_v44 = vmax.f32 %v364_v19, %v365_v20  ;;  %v372_v45 = vmax.f32 %v370_v42, %v371_v43 }
  0x7b   : > { %v367_v47 = vrot.slane %v366_v44, 1  ;;  %v373_v48 = vrot.slane %v372_v45, 1 }
  0x7c   : > { %v734_v46 = vpop.eup %733 }
  0x7d   : > { %v736_v49 = vpop.eup %735  ;;  %v401_v50 = vadd.f32 1.0, %v734_v46  ;;  %v368_v51 = vmax.f32 %v366_v44, %v367_v47  ;;  %v374_v52 = vmax.f32 %v372_v45, %v373_v48 }
  0x7e   : > { %v402_v53 = vadd.f32 1.0, %v736_v49  ;;  %v738_v54 = vpop.eup %737 }
  0x7f   : > { %v740_v55 = vpop.eup %739  ;;  %v375_v56 = vsub.f32 %v361_v34, %v368_v51  ;;  %v376_v57 = vsub.f32 %v362_v35, %v374_v52  ;;  %745 = vrcp.f32 %v401_v50  ;;  %v429_v58 = vadd.f32 1.0, %v738_v54 }
  0x80   : > { %v742_v59 = vpop.eup %741  ;;  %747 = vrcp.f32 %v402_v53  ;;  %v430_v60 = vadd.f32 1.0, %v740_v55 }
  0x81   : > { %v744_v61 = vpop.eup %743  ;;  %v377_v62 = vmul.f32 1.442695, %v375_v56  ;;  %v379_v63 = vmul.f32 1.442695, %v376_v57  ;;  %749 = vrcp.f32 %v429_v58  ;;  %v457_v0 = vadd.f32 1.0, %v742_v59 }
  0x82   : > { %751 = vrcp.f32 %v430_v60  ;;  %v458_v1 = vadd.f32 1.0, %v744_v61 }
  0x83   : > { %753 = vpow2.f32 %v377_v62 }
  0x84   : > { %755 = vpow2.f32 %v379_v63 }
  0x85   : > { %757 = vrcp.f32 %v457_v0 }
  0x86   : > { %759 = vrcp.f32 %v458_v1 }
  0x89   : > { %v746_v2 = vpop.eup %745 }
  0x8a   : > { %v748_v3 = vpop.eup %747 }
  0x8b   : > { %v750_v4 = vpop.eup %749 }
  0x8c   : > { %v752_v5 = vpop.eup %751 }
  0x8d   : > { %v754_v6 = vpop.eup %753 }
  0x8e   : > { %v756_v7 = vpop.eup %755  ;;  %v381_v8 = vrot.slane %v754_v6, 4  ;;  %v407_v9 = vmul.f32 %v754_v6, %v746_v2  ;;  %v435_v10 = vmul.f32 %v754_v6, %v750_v4 }
  0x8f   : > { %v758_v11 = vpop.eup %757  ;;  %v387_v12 = vrot.slane %v756_v7, 4  ;;  %v408_v13 = vmul.f32 %v756_v7, %v748_v3  ;;  %v436_v14 = vmul.f32 %v756_v7, %v752_v5 }
  0x90   : > { %v760_v17 = vpop.eup %759  ;;  %v382_v18 = vadd.f32 %v754_v6, %v381_v8  ;;  %v409_v21 = vrot.slane %v407_v9, 4  ;;  %v437_v22 = vrot.slane %v435_v10, 4  ;;  %v463_v23 = vmul.f32 %v758_v11, %v754_v6 }
  0x91   : > { %v388_v24 = vadd.f32 %v756_v7, %v387_v12  ;;  %v415_v15 = vrot.slane %v408_v13, 4  ;;  %v443_v16 = vrot.slane %v436_v14, 4  ;;  %v464_v25 = vmul.f32 %v760_v17, %v756_v7 }
  0x92   : > { %v383_v26 = vrot.slane %v382_v18, 2  ;;  %v410_v27 = vadd.f32 %v409_v21, %v407_v9  ;;  %v438_v28 = vadd.f32 %v437_v22, %v435_v10  ;;  %v465_v29 = vrot.slane %v463_v23, 4 }
  0x93   : > { %v389_v30 = vrot.slane %v388_v24, 2  ;;  %v416_v31 = vadd.f32 %v415_v15, %v408_v13  ;;  %v444_v32 = vadd.f32 %v443_v16, %v436_v14  ;;  %v471_v33 = vrot.slane %v464_v25, 4 }
  0x94   : > { %v384_v34 = vadd.f32 %v383_v26, %v382_v18  ;;  %v466_v35 = vadd.f32 %v465_v29, %v463_v23  ;;  %v411_v37 = vrot.slane %v410_v27, 2  ;;  %v439_v38 = vrot.slane %v438_v28, 2 }
  0x95   : > { %v390_v36 = vadd.f32 %v389_v30, %v388_v24  ;;  %v472_v39 = vadd.f32 %v471_v33, %v464_v25  ;;  %v417_v41 = vrot.slane %v416_v31, 2  ;;  %v445_v19 = vrot.slane %v444_v32, 2 }
  0x96   : > { %v385_v40 = vrot.slane %v384_v34, 1  ;;  %v467_v42 = vrot.slane %v466_v35, 2  ;;  %v412_v46 = vadd.f32 %v411_v37, %v410_v27  ;;  %v440_v47 = vadd.f32 %v439_v38, %v438_v28 }
  0x97   : > { %v391_v20 = vrot.slane %v390_v36, 1  ;;  %v473_v43 = vrot.slane %v472_v39, 2  ;;  %v418_v49 = vadd.f32 %v417_v41, %v416_v31  ;;  %v446_v50 = vadd.f32 %v445_v19, %v444_v32 }
  0x98   : > { %v386_v44 = vadd.f32 %v385_v40, %v384_v34  ;;  %v468_v48 = vadd.f32 %v467_v42, %v466_v35  ;;  %v413_v52 = vrot.slane %v412_v46, 1  ;;  %v441_v53 = vrot.slane %v440_v47, 1 }
  0x99   : > { %v392_v45 = vadd.f32 %v391_v20, %v390_v36  ;;  %v474_v51 = vadd.f32 %v473_v43, %v472_v39  ;;  %v419_v55 = vrot.slane %v418_v49, 1  ;;  %v447_v56 = vrot.slane %v446_v50, 1 }
  0x9a   : > { %761 = vrcp.f32 %v386_v44  ;;  %v469_v54 = vrot.slane %v468_v48, 1  ;;  %v414_v58 = vadd.f32 %v413_v52, %v412_v46  ;;  %v442_v59 = vadd.f32 %v441_v53, %v440_v47 }
  0x9b   : > { %763 = vrcp.f32 %v392_v45  ;;  %v475_v57 = vrot.slane %v474_v51, 1  ;;  %v420_v61 = vadd.f32 %v419_v55, %v418_v49  ;;  %v448_v62 = vadd.f32 %v447_v56, %v446_v50 }
  0x9c   : > { %v470_v60 = vadd.f32 %v469_v54, %v468_v48 }
  0x9d   : > { %v476_v63 = vadd.f32 %v475_v57, %v474_v51 }
  0xa4   : > { %v762_v0 = vpop.eup %761 }
  0xa5   : > { %v764_v1 = vpop.eup %763  ;;  %v421_v2 = vmul.f32 %v762_v0, %v414_v58  ;;  %v449_v3 = vmul.f32 %v762_v0, %v442_v59  ;;  %v477_v4 = vmul.f32 %v762_v0, %v470_v60 }
  0xa6   : > { %v422_v5 = vmul.f32 %v764_v1, %v420_v61  ;;  %v450_v6 = vmul.f32 %v764_v1, %v448_v62  ;;  %v478_v7 = vmul.f32 %v764_v1, %v476_v63 }
  0xa7   : > { %v480_v8 = vsel %vm479_vm0, %v421_v2, %v449_v3 }
  0xa8   : > { %v481_v9 = vsel %vm479_vm0, %v422_v5, %v450_v6  ;;  %v483_v10 = vsel %vm482_vm1, %v480_v8, %v477_v4 }
  0xa9   : > { %v484_v11 = vsel %vm482_vm1, %v481_v9, %v478_v7 }
  0xaa   : > { %v487_v12 = vcombine.low %v483_v10, %v484_v11 }
  0xac   : > { %489 = vst [vmem:[%s242_s21] sm:$0x77] %v487_v12 }
  0xad PF: > { %s18_s17 = sadd.s32 1, %s881_s17   ;;  %s1157_s12 = smov %s865_s13 }
  0xae   : > { %p15_p11 = scmp.ge.s32.totalorder %s18_s17, 4   ;;  %s1158_s13 = smov %s869_s14 }
  0xaf   : > { %s1159_s14 = smov %s1009_s7  ;;  %s1160_s15 = smov %s877_s16 }
  0xb0   : > { %s1161_s16 = smov %s1163_s28  ;;  %17 = sbr.rel (!%p15_p11) target bundleno = 6 (0x6), region = 85 }
  0xb7   :  { %520 = vsyncpa [#allocation3], 1 }
  0xb8   :  { %522 = vsyncpa [#allocation3 + $0x1], 1 }
  0xb9   :  { %523 = vsyncpa [#allocation4], 1 }
  0xba   :  { %525 = vsyncpa [#allocation4 + $0x1], 1 }
  0xbb   :  { %526 = vsyncpa [#allocation5], 1 }
  0xbc   :  { %528 = vsyncpa [#allocation5 + $0x1], 1 }

</bundles_post_ra>
